<compile_context>
chip_gen: v5e
topology: v5e:2x2
jax: 0.10.0
libtpu: 0.0.40
codegen_flags: <defaults>
</compile_context>

<pallas_src>
import math
import jax
import jax.numpy as jnp
from jax.experimental import pallas as pl
from jax.experimental.pallas import tpu as pltpu

# ---------------- configuration (small, forward-consistent shapes) ----------------
N = 2                 # batch
C_IN = 16             # feature channels (RPN head hidden channels == C_IN)
H = W = 16            # feature map spatial size
STRIDE = 4            # feature stride -> image is 64x64
IMG_H = IMG_W = H * STRIDE
SIZES = (32.0,)
ASPECT_RATIOS = (0.5, 1.0, 2.0)
A = len(SIZES) * len(ASPECT_RATIOS)   # anchors per location
HW = H * W
R = HW * A                            # total anchors per image
NHW = N * HW                          # 512: lane dimension of every kernel tensor
assert (H & (H - 1)) == 0 and (W & (W - 1)) == 0, "in-kernel anchor iota assumes pow2 H, W"
W_SHIFT = W.bit_length() - 1          # log2(W)
SCALE_CLAMP = math.log(1000.0 / 16.0)
PRE_NMS_TOPK = (64, 128)              # (test, train); eval uses index 0
POST_NMS_TOPK = (16, 32)
MIN_BOX_SIZE = 0.0

# base anchor widths/heights (DefaultAnchorGenerator: sizes x aspect_ratios, offset 0)
BASE_W = tuple(math.sqrt(s * s / r) for s in SIZES for r in ASPECT_RATIOS)
BASE_H = tuple(math.sqrt(s * s / r) * r for s in SIZES for r in ASPECT_RATIOS)

KROWS = 9 * C_IN + 1    # im2col rows + ones row (conv bias)
HID = C_IN + 1          # hidden rows + constant-1 row (head bias)
OUT_ROWS = 5 * A        # [obj | x1 | y1 | x2 | y2]


# ---------------- fused Pallas kernel: conv3x3 + relu + heads + decode + clip ----------------
def rpn_fused_kernel(xi_ref, wc_ref, wh_ref, out_ref):
    # conv3x3 (+bias, folded) + ReLU as ONE MXU matmul over the pre-shifted im2col slab
    hidden = jnp.maximum(
        jnp.dot(wc_ref[...], xi_ref[...], preferred_element_type=jnp.float32),
        0.0)                                                     # (HID, NHW); last row == 1.0

    # fused objectness + anchor-delta 1x1 heads (+bias via the constant-1 hidden row)
    heads = jnp.dot(wh_ref[...], hidden.astype(jnp.bfloat16),
                    preferred_element_type=jnp.float32)          # (5A, NHW)

    obj = heads[:A]                                              # objectness logits
    dxs = heads[A:2 * A]                                         # dx * anchor_w (scale folded in)
    dys = heads[2 * A:3 * A]                                     # dy * anchor_h (scale folded in)
    dw = jnp.minimum(heads[3 * A:4 * A], SCALE_CLAMP)
    dh = jnp.minimum(heads[4 * A:5 * A], SCALE_CLAMP)

    # anchor geometry generated in-kernel (no anchor DMA): lane p = n*HW + h*W + w
    row = jax.lax.broadcasted_iota(jnp.int32, (A, NHW), 0)
    p = jax.lax.broadcasted_iota(jnp.int32, (A, NHW), 1)
    cx = ((p & (W - 1)) * STRIDE).astype(jnp.float32)
    cy = (((p >> W_SHIFT) & (H - 1)) * STRIDE).astype(jnp.float32)
    aw = jnp.full((A, NHW), BASE_W[A - 1], jnp.float32)
    ah = jnp.full((A, NHW), BASE_H[A - 1], jnp.float32)
    for a in range(A - 1):
        aw = jnp.where(row == a, BASE_W[a], aw)
        ah = jnp.where(row == a, BASE_H[a], ah)

    # Box2BoxTransform.apply_deltas + clip to image
    px = dxs + cx
    py = dys + cy
    pw = jnp.exp(dw) * aw
    ph = jnp.exp(dh) * ah
    x1 = jnp.clip(px - 0.5 * pw, 0.0, float(IMG_W))
    y1 = jnp.clip(py - 0.5 * ph, 0.0, float(IMG_H))
    x2 = jnp.clip(px + 0.5 * pw, 0.0, float(IMG_W))
    y2 = jnp.clip(py + 0.5 * ph, 0.0, float(IMG_H))

    # one lane-dense (15, 512) slab, single writeback DMA
    out_ref[...] = jnp.concatenate([obj, x1, y1, x2, y2], axis=0)


def run_rpn_fused(xi, wconv, whead):
    grid_spec = pltpu.PrefetchScalarGridSpec(
        num_scalar_prefetch=0,
        grid=(1,),
        in_specs=[
            pl.BlockSpec((KROWS, NHW), lambda i: (0, 0)),
            pl.BlockSpec((HID, KROWS), lambda i: (0, 0)),
            pl.BlockSpec((OUT_ROWS, HID), lambda i: (0, 0)),
        ],
        out_specs=pl.BlockSpec((OUT_ROWS, NHW), lambda i: (0, 0)),
    )
    return pl.pallas_call(
        rpn_fused_kernel,
        out_shape=jax.ShapeDtypeStruct((OUT_ROWS, NHW), jnp.float32),
        grid_spec=grid_spec,
        compiler_params=pltpu.CompilerParams(dimension_semantics=("arbitrary",)),
    )(xi, wconv, whead)


# ---------------- plain-JAX glue ----------------
def find_top_rpn_proposals(proposals, logits):
    # proposals: (N, R, 4); logits: (N, R). Eval path -> pre/post topk index 0.
    k = min(PRE_NMS_TOPK[0], R)
    widths = proposals[..., 2] - proposals[..., 0]
    heights = proposals[..., 3] - proposals[..., 1]
    keep = (widths > MIN_BOX_SIZE) & (heights > MIN_BOX_SIZE)
    scores = jnp.where(keep, logits, -jnp.inf)
    topk_scores, topk_idx = jax.lax.top_k(scores, k)
    topk_boxes = jnp.take_along_axis(proposals, topk_idx[..., None], axis=1)
    # TODO(synk): batched NMS (find_top_rpn_proposals) has no clean Pallas/TPU
    # equivalent; proposals are returned score-sorted (top-k) without NMS.
    kk = min(POST_NMS_TOPK[0], k)
    return topk_boxes[:, :kk], topk_scores[:, :kk]


@jax.jit
def rpn_forward(features_nchw, wc, bc, wo, bo, wd, bd):
    # ---- trace-time repacking (tiny; fused by XLA) ----
    # 3x3 im2col (padding=1): rows = tap*C_IN + cin (tap-major, contiguous),
    # lanes = n*HW + h*W + w; plus a ones row so the conv bias rides the MXU.
    xp = jnp.pad(features_nchw, ((0, 0), (0, 0), (1, 1), (1, 1)))
    taps = [xp[:, :, ky:ky + H, kx:kx + W] for ky in range(3) for kx in range(3)]
    xi = jnp.stack(taps, axis=0)                                    # (9, N, C, H, W)
    xi = jnp.transpose(xi, (0, 2, 1, 3, 4)).reshape(9 * C_IN, NHW)
    xi = jnp.concatenate([xi, jnp.ones((1, NHW), xi.dtype)], axis=0).astype(jnp.bfloat16)

    # conv weight (ky,kx,cin,cout) -> (cout, tap*cin) with a bias column;
    # extra row [0..0, 1] makes hidden's last row a constant 1 (head-bias carrier).
    wct = jnp.transpose(wc.reshape(9, C_IN, C_IN), (2, 0, 1)).reshape(C_IN, 9 * C_IN)
    wconv = jnp.concatenate([wct, bc.reshape(C_IN, 1)], axis=1)     # (C_IN, KROWS)
    bias_row = jnp.zeros((1, KROWS), wconv.dtype).at[0, -1].set(1.0)
    wconv = jnp.concatenate([wconv, bias_row], axis=0).astype(jnp.bfloat16)   # (HID, KROWS)

    # fused head rows = [obj | dx | dy | dw | dh] with bias column appended;
    # dx/dy rows pre-scaled by the per-anchor base width/height.
    wo_t = wo.T                                                     # (A, C_IN)
    wd_cg = jnp.transpose(wd.T.reshape(A, 4, C_IN), (1, 0, 2)).reshape(4 * A, C_IN)
    wh = jnp.concatenate([wo_t, wd_cg], axis=0)                     # (5A, C_IN)
    bo_t = bo.reshape(A, 1)
    bd_cg = bd.reshape(A, 4).T.reshape(4 * A, 1)
    bh = jnp.concatenate([bo_t, bd_cg], axis=0)                     # (5A, 1)
    whead = jnp.concatenate([wh, bh], axis=1)                       # (5A, HID)
    scale = jnp.concatenate([
        jnp.ones((A,), jnp.float32),
        jnp.asarray(BASE_W, jnp.float32),
        jnp.asarray(BASE_H, jnp.float32),
        jnp.ones((2 * A,), jnp.float32),
    ])
    whead = (whead * scale[:, None]).astype(jnp.bfloat16)

    out = run_rpn_fused(xi, wconv, whead)                           # (5A, NHW) f32

    # pred_objectness_logits: (N, H*W*A) in (h, w, a) order
    pred_objectness_logits = jnp.transpose(
        out[:A].reshape(A, N, HW), (1, 2, 0)).reshape(N, R)
    # decoded, clipped proposals: (N, R, 4)
    proposals = jnp.transpose(
        out[A:].reshape(4, A, N, HW), (2, 3, 1, 0)).reshape(N, R, 4)

    boxes, scores = find_top_rpn_proposals(proposals, pred_objectness_logits)
    losses = {}  # eval mode: reference returns an empty dict
    return {"proposal_boxes": boxes, "objectness_logits": scores}, losses


# ---------------- main ----------------
if __name__ == "__main__":
    key = jax.random.PRNGKey(0)
    k1, k2, k3, k4 = jax.random.split(key, 4)
    # Deterministic RPN head params (detectron2 StandardRPNHead: std=0.01, zero bias)
    wc = jax.random.normal(k1, (3, 3, C_IN, C_IN), jnp.float32) * 0.01   # (ky,kx,cin,cout)
    bc = jnp.zeros((1, C_IN), jnp.float32)
    wo = jax.random.normal(k2, (C_IN, A), jnp.float32) * 0.01
    bo = jnp.zeros((1, A), jnp.float32)
    wd = jax.random.normal(k3, (C_IN, 4 * A), jnp.float32) * 0.01        # col = a*4 + coord
    bd = jnp.zeros((1, 4 * A), jnp.float32)

    features = jax.random.normal(k4, (N, C_IN, H, W), jnp.float32)  # NCHW, as PyTorch would pass

    proposals, losses = rpn_forward(features, wc, bc, wo, bo, wd, bd)
    jax.block_until_ready(proposals["proposal_boxes"])
    jax.block_until_ready(proposals["objectness_logits"])

    kk = min(POST_NMS_TOPK[0], PRE_NMS_TOPK[0])
    assert proposals["proposal_boxes"].shape == (N, kk, 4)
    assert proposals["objectness_logits"].shape == (N, kk)
    assert losses == {}
    print("KERNEL_OK")
</pallas_src>

<mosaic_0001>
module attributes {stable_mosaic.version = 11 : i64} {
  func.func @rpn_fused_kernel(%arg0: i32, %arg1: memref<145x512xbf16, #tpu.memory_space<vmem>>, %arg2: memref<17x145xbf16, #tpu.memory_space<vmem>>, %arg3: memref<15x17xbf16, #tpu.memory_space<vmem>>, %arg4: memref<15x512xf32, #tpu.memory_space<vmem>>) attributes {dimension_semantics = [#tpu.dimension_semantics<arbitrary>], iteration_bounds = array<i64: 1>, scalar_prefetch = 0 : i64, scratch_operands = 0 : i64, tpu.core_type = #tpu.core_type<tc>, window_params = [{pipeline_mode = #tpu.pipeline_mode<synchronous>, transform_indices = @transform_0, window_bounds = array<i64: 145, 512>}, {pipeline_mode = #tpu.pipeline_mode<synchronous>, transform_indices = @transform_1, window_bounds = array<i64: 17, 145>}, {pipeline_mode = #tpu.pipeline_mode<synchronous>, transform_indices = @transform_2, window_bounds = array<i64: 15, 17>}, {pipeline_mode = #tpu.pipeline_mode<synchronous>, transform_indices = @transform_3, window_bounds = array<i64: 15, 512>}]} {
    %c0 = arith.constant 0 : index
    %c0_0 = arith.constant 0 : index
    %0 = vector.load %arg2[%c0, %c0_0] : memref<17x145xbf16, #tpu.memory_space<vmem>>, vector<17x145xbf16>
    %c0_1 = arith.constant 0 : index
    %c0_2 = arith.constant 0 : index
    %1 = vector.load %arg1[%c0_1, %c0_2] : memref<145x512xbf16, #tpu.memory_space<vmem>>, vector<145x512xbf16>
    %cst = arith.constant dense<0.000000e+00> : vector<17x512xf32>
    %2 = tpu.matmul %0, %1, %cst {dimension_numbers = #tpu.dot_dimension_numbers<[1], [0], [0], [1], [0, 0, 1, 1], [], []>} : vector<17x145xbf16>, vector<145x512xbf16>, vector<17x512xf32> -> vector<17x512xf32>
    %cst_3 = arith.constant 0.000000e+00 : f32
    %3 = vector.broadcast %cst_3 : f32 to vector<17x512xf32>
    %4 = arith.maximumf %2, %3 : vector<17x512xf32>
    %c0_4 = arith.constant 0 : index
    %c0_5 = arith.constant 0 : index
    %5 = vector.load %arg3[%c0_4, %c0_5] : memref<15x17xbf16, #tpu.memory_space<vmem>>, vector<15x17xbf16>
    %6 = arith.truncf %4 : vector<17x512xf32> to vector<17x512xbf16>
    %cst_6 = arith.constant dense<0.000000e+00> : vector<15x512xf32>
    %7 = tpu.matmul %5, %6, %cst_6 {dimension_numbers = #tpu.dot_dimension_numbers<[1], [0], [0], [1], [0, 0, 1, 1], [], []>} : vector<15x17xbf16>, vector<17x512xbf16>, vector<15x512xf32> -> vector<15x512xf32>
    %8 = vector.extract_strided_slice %7 {offsets = [0, 0], sizes = [3, 512], strides = [1, 1]} : vector<15x512xf32> to vector<3x512xf32>
    %9 = vector.extract_strided_slice %7 {offsets = [3, 0], sizes = [3, 512], strides = [1, 1]} : vector<15x512xf32> to vector<3x512xf32>
    %10 = vector.extract_strided_slice %7 {offsets = [6, 0], sizes = [3, 512], strides = [1, 1]} : vector<15x512xf32> to vector<3x512xf32>
    %11 = vector.extract_strided_slice %7 {offsets = [9, 0], sizes = [3, 512], strides = [1, 1]} : vector<15x512xf32> to vector<3x512xf32>
    %cst_7 = arith.constant 4.13516665 : f32
    %12 = vector.broadcast %cst_7 : f32 to vector<3x512xf32>
    %13 = arith.minimumf %11, %12 : vector<3x512xf32>
    %14 = vector.extract_strided_slice %7 {offsets = [12, 0], sizes = [3, 512], strides = [1, 1]} : vector<15x512xf32> to vector<3x512xf32>
    %cst_8 = arith.constant 4.13516665 : f32
    %15 = vector.broadcast %cst_8 : f32 to vector<3x512xf32>
    %16 = arith.minimumf %14, %15 : vector<3x512xf32>
    %17 = tpu.iota {dimensions = array<i32: 0>} : vector<3x512xi32>
    %18 = tpu.iota {dimensions = array<i32: 1>} : vector<3x512xi32>
    %c15_i32 = arith.constant 15 : i32
    %19 = vector.broadcast %c15_i32 : i32 to vector<3x512xi32>
    %20 = arith.andi %18, %19 : vector<3x512xi32>
    %c4_i32 = arith.constant 4 : i32
    %21 = vector.broadcast %c4_i32 : i32 to vector<3x512xi32>
    %22 = arith.muli %20, %21 : vector<3x512xi32>
    %23 = arith.sitofp %22 : vector<3x512xi32> to vector<3x512xf32>
    %c4_i32_9 = arith.constant 4 : i32
    %24 = vector.broadcast %c4_i32_9 : i32 to vector<3x512xi32>
    %25 = arith.shrsi %18, %24 : vector<3x512xi32>
    %c15_i32_10 = arith.constant 15 : i32
    %26 = vector.broadcast %c15_i32_10 : i32 to vector<3x512xi32>
    %27 = arith.andi %25, %26 : vector<3x512xi32>
    %c4_i32_11 = arith.constant 4 : i32
    %28 = vector.broadcast %c4_i32_11 : i32 to vector<3x512xi32>
    %29 = arith.muli %27, %28 : vector<3x512xi32>
    %30 = arith.sitofp %29 : vector<3x512xi32> to vector<3x512xf32>
    %cst_12 = arith.constant 22.6274166 : f32
    %31 = vector.broadcast %cst_12 : f32 to vector<3x512xf32>
    %cst_13 = arith.constant 45.2548332 : f32
    %32 = vector.broadcast %cst_13 : f32 to vector<3x512xf32>
    %c0_i32 = arith.constant 0 : i32
    %33 = vector.broadcast %c0_i32 : i32 to vector<3x512xi32>
    %34 = arith.cmpi eq, %17, %33 : vector<3x512xi32>
    %cst_14 = arith.constant 45.2548332 : f32
    %35 = vector.broadcast %cst_14 : f32 to vector<3x512xf32>
    %36 = arith.select %34, %35, %31 : vector<3x512xi1>, vector<3x512xf32>
    %c0_i32_15 = arith.constant 0 : i32
    %37 = vector.broadcast %c0_i32_15 : i32 to vector<3x512xi32>
    %38 = arith.cmpi eq, %17, %37 : vector<3x512xi32>
    %cst_16 = arith.constant 22.6274166 : f32
    %39 = vector.broadcast %cst_16 : f32 to vector<3x512xf32>
    %40 = arith.select %38, %39, %32 : vector<3x512xi1>, vector<3x512xf32>
    %c1_i32 = arith.constant 1 : i32
    %41 = vector.broadcast %c1_i32 : i32 to vector<3x512xi32>
    %42 = arith.cmpi eq, %17, %41 : vector<3x512xi32>
    %cst_17 = arith.constant 3.200000e+01 : f32
    %43 = vector.broadcast %cst_17 : f32 to vector<3x512xf32>
    %44 = arith.select %42, %43, %36 : vector<3x512xi1>, vector<3x512xf32>
    %c1_i32_18 = arith.constant 1 : i32
    %45 = vector.broadcast %c1_i32_18 : i32 to vector<3x512xi32>
    %46 = arith.cmpi eq, %17, %45 : vector<3x512xi32>
    %cst_19 = arith.constant 3.200000e+01 : f32
    %47 = vector.broadcast %cst_19 : f32 to vector<3x512xf32>
    %48 = arith.select %46, %47, %40 : vector<3x512xi1>, vector<3x512xf32>
    %49 = arith.addf %9, %23 : vector<3x512xf32>
    %50 = arith.addf %10, %30 : vector<3x512xf32>
    %51 = math.exp %13 : vector<3x512xf32>
    %52 = arith.mulf %51, %44 : vector<3x512xf32>
    %53 = math.exp %16 : vector<3x512xf32>
    %54 = arith.mulf %53, %48 : vector<3x512xf32>
    %cst_20 = arith.constant 5.000000e-01 : f32
    %55 = vector.broadcast %cst_20 : f32 to vector<3x512xf32>
    %56 = arith.mulf %55, %52 : vector<3x512xf32>
    %57 = arith.subf %49, %56 : vector<3x512xf32>
    %cst_21 = arith.constant 0.000000e+00 : f32
    %cst_22 = arith.constant 6.400000e+01 : f32
    %58 = vector.broadcast %cst_21 : f32 to vector<3x512xf32>
    %59 = arith.maximumf %58, %57 : vector<3x512xf32>
    %60 = vector.broadcast %cst_22 : f32 to vector<3x512xf32>
    %61 = arith.minimumf %60, %59 : vector<3x512xf32>
    %cst_23 = arith.constant 5.000000e-01 : f32
    %62 = vector.broadcast %cst_23 : f32 to vector<3x512xf32>
    %63 = arith.mulf %62, %54 : vector<3x512xf32>
    %64 = arith.subf %50, %63 : vector<3x512xf32>
    %cst_24 = arith.constant 0.000000e+00 : f32
    %cst_25 = arith.constant 6.400000e+01 : f32
    %65 = vector.broadcast %cst_24 : f32 to vector<3x512xf32>
    %66 = arith.maximumf %65, %64 : vector<3x512xf32>
    %67 = vector.broadcast %cst_25 : f32 to vector<3x512xf32>
    %68 = arith.minimumf %67, %66 : vector<3x512xf32>
    %cst_26 = arith.constant 5.000000e-01 : f32
    %69 = vector.broadcast %cst_26 : f32 to vector<3x512xf32>
    %70 = arith.mulf %69, %52 : vector<3x512xf32>
    %71 = arith.addf %49, %70 : vector<3x512xf32>
    %cst_27 = arith.constant 0.000000e+00 : f32
    %cst_28 = arith.constant 6.400000e+01 : f32
    %72 = vector.broadcast %cst_27 : f32 to vector<3x512xf32>
    %73 = arith.maximumf %72, %71 : vector<3x512xf32>
    %74 = vector.broadcast %cst_28 : f32 to vector<3x512xf32>
    %75 = arith.minimumf %74, %73 : vector<3x512xf32>
    %cst_29 = arith.constant 5.000000e-01 : f32
    %76 = vector.broadcast %cst_29 : f32 to vector<3x512xf32>
    %77 = arith.mulf %76, %54 : vector<3x512xf32>
    %78 = arith.addf %50, %77 : vector<3x512xf32>
    %cst_30 = arith.constant 0.000000e+00 : f32
    %cst_31 = arith.constant 6.400000e+01 : f32
    %79 = vector.broadcast %cst_30 : f32 to vector<3x512xf32>
    %80 = arith.maximumf %79, %78 : vector<3x512xf32>
    %81 = vector.broadcast %cst_31 : f32 to vector<3x512xf32>
    %82 = arith.minimumf %81, %80 : vector<3x512xf32>
    %83 = tpu.concatenate %8, %61, %68, %75, %82 in 0 : vector<3x512xf32>, vector<3x512xf32>, vector<3x512xf32>, vector<3x512xf32>, vector<3x512xf32> -> vector<15x512xf32>
    %c0_32 = arith.constant 0 : index
    %c0_33 = arith.constant 0 : index
    %84 = vector.load %arg4[%c0_32, %c0_33] : memref<15x512xf32, #tpu.memory_space<vmem>>, vector<15x512xf32>
    tpu.vector_store %arg4[%c0_32, %c0_33], %83 {strides = array<i32>} : memref<15x512xf32, #tpu.memory_space<vmem>>, vector<15x512xf32>,
    return
  }
  func.func @transform_0(%arg0: i32) -> (i32, i32) {
    %c0_i32 = arith.constant 0 : i32
    %c0_i32_0 = arith.constant 0 : i32
    %c0_i32_1 = arith.constant 0 : i32
    return %c0_i32, %c0_i32_0 : i32, i32
  }
  func.func @transform_1(%arg0: i32) -> (i32, i32) {
    %c0_i32 = arith.constant 0 : i32
    %c0_i32_0 = arith.constant 0 : i32
    %c0_i32_1 = arith.constant 0 : i32
    return %c0_i32, %c0_i32_0 : i32, i32
  }
  func.func @transform_2(%arg0: i32) -> (i32, i32) {
    %c0_i32 = arith.constant 0 : i32
    %c0_i32_0 = arith.constant 0 : i32
    %c0_i32_1 = arith.constant 0 : i32
    return %c0_i32, %c0_i32_0 : i32, i32
  }
  func.func @transform_3(%arg0: i32) -> (i32, i32) {
    %c0_i32 = arith.constant 0 : i32
    %c0_i32_0 = arith.constant 0 : i32
    %c0_i32_1 = arith.constant 0 : i32
    return %c0_i32, %c0_i32_0 : i32, i32
  }
}

</mosaic_0001>

<bundles_post_ra>
// kernel: rpn_forward.1
= control target key start
LH: loop header
LB: loop body
LE: loop exit
PB: predicated region body
PF: predicated region fallthrough
CT: control target
= control target key end

     0   :  { %vm268_vm0 = vcmask 1040384   ;;  %v993_v19 = vmov 0   ;;  %vm261_vm1 = vcmask 138240   ;;  %vm728_vm4 = vcmask 1045504   ;;  %s1389_s0 = inlined_call_operand.vmem [shape: bf16[145,512], index: 0, kind: input, shape index: {}]   ;;  %s1390_s1 = inlined_call_operand.vmem [shape: bf16[17,145], index: 1, kind: input, shape index: {}]   ;;  %s1391_s2 = inlined_call_operand.vmem [shape: bf16[15,17], index: 2, kind: input, shape index: {}]   ;;  %s1392_s3 = inlined_call_operand.vmem [shape: f32[15,512], index: 3, kind: output, shape index: {}]  }
   0x1   :  { %v897_v0 = vld [vmem:[%s1389_s0 + $0xe0] sm:$0xf]  ;;  %v975_v1 = vld [vmem:[%s1389_s0 + $0xec] sm:$0xf0]  ;;  %v973_v2 = vld [vmem:[%s1389_s0 + $0xe4] sm:$0xf] }
   0x2   :  { %v898_v3 = vor.u32 %v975_v1, %v897_v0  ;;  %v899_v4 = vld [vmem:[%s1389_s0 + $0xf0] sm:$0xf0]  ;;  %v881_v5 = vld [vmem:[%s1389_s0 + $0xc0] sm:$0xf]  ;;  %v971_v6 = vld [vmem:[%s1389_s0 + $0xcc] sm:$0xf0] }
   0x3   :  { %v902_v7 = vor.u32 %v973_v2, %v899_v4  ;;  %v969_v8 = vld [vmem:[%s1389_s0 + $0xc4] sm:$0xf]  ;;  %v883_v9 = vld [vmem:[%s1389_s0 + $0xd0] sm:$0xf0]  ;;  %v882_v10 = vor.u32 %v971_v6, %v881_v5  ;;  %v865_v12 = vld [vmem:[%s1389_s0 + $0xa0] sm:$0xf] }
   0x4   :  { %283 = vmatpush.bf16.msra.mxu0 %v898_v3  ;;  %v886_v11 = vor.u32 %v969_v8, %v883_v9  ;;  %v967_v13 = vld [vmem:[%s1389_s0 + $0xac] sm:$0xf0]  ;;  %v54_v14 = vld [vmem:[%s1389_s0 + $0x120] sm:$0x11]  ;;  %v867_v16 = vld [vmem:[%s1389_s0 + $0xb0] sm:$0xf0] }
   0x5   :  { %319 = vmatpush.bf16.msra.mxu2 %v902_v7  ;;  %v965_v15 = vld [vmem:[%s1389_s0 + $0xa4] sm:$0xf]  ;;  %v182_v17 = vunpack.c.h.b16 %v54_v14  ;;  %v181_v18 = vunpack.c.l.b16 %v54_v14  ;;  %v1056_v20 = vsel %vm268_vm0, 65535, %v993_v19  ;;  %v866_v21 = vor.u32 %v967_v13, %v865_v12  ;;  %v849_v23 = vld [vmem:[%s1389_s0 + $0x80] sm:$0xf] }
   0x6   :  { %v963_v24 = vld [vmem:[%s1389_s0 + $0x8c] sm:$0xf0]  ;;  %v870_v26 = vor.u32 %v965_v15, %v867_v16  ;;  %v961_v27 = vld [vmem:[%s1389_s0 + $0x84] sm:$0xf]  ;;  %v915_v29 = vld [vmem:[%s1389_s0 + $0x110] sm:$0xf0] }
   0x7   :  { %v222_v22 = vpack.c.b16 %v182_v17, %v182_v17  ;;  %v221_v25 = vpack.c.b16 %v181_v18, %v181_v18  ;;  %v977_v28 = vld [vmem:[%s1389_s0 + $0x104] sm:$0xf]  ;;  %v851_v31 = vld [vmem:[%s1389_s0 + $0x90] sm:$0xf0]  ;;  %v913_v33 = vld [vmem:[%s1389_s0 + $0x100] sm:$0xf]  ;;  %v850_v36 = vor.u32 %v963_v24, %v849_v23 }
   0x8   :  { %284 = vmatpush.bf16.msra.mxu0 %v882_v10  ;;  %v979_v34 = vld [vmem:[%s1389_s0 + $0x10c] sm:$0xf0]  ;;  %v905_v35 = vld [vmem:[%s1389_s0 + $0xe8] sm:$0xf]  ;;  %v918_v37 = vor.u32 %v977_v28, %v915_v29  ;;  %v943_v38 = vld [vmem:[%s1390_s1 + $0x4] sm:$0xf]  ;;  %v854_v41 = vor.u32 %v961_v27, %v851_v31 }
   0x9   :  { %320 = vmatpush.bf16.msra.mxu2 %v886_v11  ;;  %v275_v30 = vand.u32 %v1056_v20, %v222_v22  ;;  %v272_v32 = vand.u32 %v1056_v20, %v221_v25  ;;  %v779_v39 = vld [vmem:[%s1390_s1 + $0x8] sm:$0xf0]  ;;  %v976_v40 = vld [vmem:[%s1389_s0 + $0xf4] sm:$0xf0]  ;;  %v833_v42 = vld [vmem:[%s1389_s0 + $0x60] sm:$0xf]  ;;  %v914_v44 = vor.u32 %v979_v34, %v913_v33 }
   0xa   :  { %v959_v43 = vld [vmem:[%s1389_s0 + $0x6c] sm:$0xf0]  ;;  %v957_v45 = vld [vmem:[%s1389_s0 + $0x64] sm:$0xf]  ;;  %v835_v46 = vld [vmem:[%s1389_s0 + $0x70] sm:$0xf0]  ;;  %v906_v47 = vor.u32 %v976_v40, %v905_v35  ;;  %v1108_v48 = vor.u32 %v943_v38, %v779_v39 }
   0xb   :  { %343 = vmatpush.bf16.msra.mxu3 %v275_v30  ;;  %307 = vmatpush.bf16.msra.mxu1 %v272_v32  ;;  %v889_v49 = vld [vmem:[%s1389_s0 + $0xc8] sm:$0xf]  ;;  %v972_v50 = vld [vmem:[%s1389_s0 + $0xd4] sm:$0xf0]  ;;  %v834_v51 = vor.u32 %v959_v43, %v833_v42  ;;  %v838_v52 = vor.u32 %v957_v45, %v835_v46  ;;  %v817_v53 = vld [vmem:[%s1389_s0 + $0x40] sm:$0xf] }
   0xc   :  { %285 = vmatpush.bf16.msra.mxu0 %v866_v21  ;;  %v955_v54 = vld [vmem:[%s1389_s0 + $0x4c] sm:$0xf0]  ;;  %v953_v55 = vld [vmem:[%s1389_s0 + $0x44] sm:$0xf]  ;;  %v819_v56 = vld [vmem:[%s1389_s0 + $0x50] sm:$0xf0]  ;;  %v890_v57 = vor.u32 %v972_v50, %v889_v49 }
   0xd   :  { %321 = vmatpush.bf16.msra.mxu2 %v870_v26  ;;  %v873_v58 = vld [vmem:[%s1389_s0 + $0xa8] sm:$0xf]  ;;  %v968_v59 = vld [vmem:[%s1389_s0 + $0xb4] sm:$0xf0]  ;;  %v818_v60 = vor.u32 %v955_v54, %v817_v53  ;;  %v822_v62 = vor.u32 %v953_v55, %v819_v56  ;;  %v801_v63 = vld [vmem:[%s1389_s0 + $0x20] sm:$0xf] }
   0xe   :  { %v55_v61 = vld [vmem:[%s1389_s0 + $0x128] sm:$0x11]  ;;  %v951_v0 = vld [vmem:[%s1389_s0 + $0x2c] sm:$0xf0]  ;;  %v949_v2 = vld [vmem:[%s1389_s0 + $0x24] sm:$0xf]  ;;  %v874_v4 = vor.u32 %v968_v59, %v873_v58 }
   0xf   :  { %344 = vmatpush.bf16.msra.mxu3 %v918_v37  ;;  %308 = vmatpush.bf16.msra.mxu1 %v914_v44  ;;  %v183_v1 = vunpack.c.l.b16 %v55_v61  ;;  %v803_v3 = vld [vmem:[%s1389_s0 + $0x30] sm:$0xf0]  ;;  %v184_v5 = vunpack.c.h.b16 %v55_v61  ;;  %v857_v6 = vld [vmem:[%s1389_s0 + $0x88] sm:$0xf]  ;;  %v964_v7 = vld [vmem:[%s1389_s0 + $0x94] sm:$0xf0]  ;;  %v802_v9 = vor.u32 %v951_v0, %v801_v63 }
  0x10   :  { %286 = vmatpush.bf16.msra.mxu0 %v850_v36  ;;  %v1162_v10 = vld [vmem:[%s1390_s1 + $0x10] sm:$0x11]  ;;  %v921_v11 = vld [vmem:[%s1389_s0 + $0x108] sm:$0xf]  ;;  %v980_v12 = vld [vmem:[%s1389_s0 + $0x114] sm:$0xf0]  ;;  %v806_v13 = vor.u32 %v949_v2, %v803_v3  ;;  %v858_v22 = vor.u32 %v964_v7, %v857_v6 }
  0x11   :  { %322 = vmatpush.bf16.msra.mxu2 %v854_v41  ;;  %v223_v8 = vpack.c.b16 %v183_v1, %v183_v1  ;;  %v785_v14 = vld [vmem:[%s1389_s0] sm:$0xf]  ;;  %v947_v15 = vld [vmem:[%s1389_s0 + $0xc] sm:$0xf0]  ;;  %v945_v16 = vld [vmem:[%s1389_s0 + $0x4] sm:$0xf]  ;;  %v224_v23 = vpack.c.b16 %v184_v5, %v184_v5  ;;  %v64_v24 = vunpack.c.h.b16 %v1162_v10  ;;  %v922_v27 = vor.u32 %v980_v12, %v921_v11 }
  0x12   :  { %929 = vmatmul.msk.bf16.vlgmr.msra.gmra.mxu3 %vm261_vm1, %v1108_v48  ;;  %927 = vmatmul.msk.bf16.vlgmr.msra.gmra.mxu1 %vm261_vm1, %v1108_v48  ;;  %v787_v18 = vld [vmem:[%s1389_s0 + $0x10] sm:$0xf0]  ;;  %v974_v19 = vld [vmem:[%s1389_s0 + $0xec] sm:$0xf]  ;;  %v907_v21 = vld [vmem:[%s1389_s0 + $0xf8] sm:$0xf0]  ;;  %v786_v28 = vor.u32 %v947_v15, %v785_v14  ;;  %v63_v61 = vunpack.c.l.b16 %v1162_v10 }
  0x13   :  { %355 = vmatpush.bf16.msrb.mxu1 %v906_v47  ;;  %v278_v17 = vand.u32 %v1056_v20, %v223_v8  ;;  %v841_v25 = vld [vmem:[%s1389_s0 + $0x68] sm:$0xf]  ;;  %v960_v26 = vld [vmem:[%s1389_s0 + $0x74] sm:$0xf0]  ;;  %v777_v29 = vld [vmem:[%s1390_s1] sm:$0xf]  ;;  %v790_v31 = vor.u32 %v945_v16, %v787_v18  ;;  %v910_v32 = vor.u32 %v974_v19, %v907_v21  ;;  %v281_v36 = vand.u32 %v1056_v20, %v224_v23 }
  0x14   :  { %287 = vmatpush.bf16.msra.mxu0 %v834_v51  ;;  %v944_v30 = vld [vmem:[%s1390_s1 + $0x4] sm:$0xf0]  ;;  %v970_v33 = vld [vmem:[%s1389_s0 + $0xcc] sm:$0xf]  ;;  %v891_v34 = vld [vmem:[%s1389_s0 + $0xd8] sm:$0xf0]  ;;  %v842_v35 = vor.u32 %v960_v26, %v841_v25  ;;  %v1212_v39 = vpack.c.b16 %v64_v24, %v64_v24  ;;  %v67_v1 = vpack.c.b16 %v63_v61, %v63_v61 }
  0x15   :  { %323 = vmatpush.bf16.msra.mxu2 %v838_v52  ;;  %379 = vmatpush.bf16.msrb.mxu3 %v278_v17  ;;  %v825_v37 = vld [vmem:[%s1389_s0 + $0x48] sm:$0xf]  ;;  %v778_v38 = vor.u32 %v944_v30, %v777_v29  ;;  %v956_v40 = vld [vmem:[%s1389_s0 + $0x54] sm:$0xf0]  ;;  %v978_v41 = vld [vmem:[%s1389_s0 + $0x10c] sm:$0xf]  ;;  %v894_v43 = vor.u32 %v970_v33, %v891_v34 }
  0x16   :  { %v923_v42 = vld [vmem:[%s1389_s0 + $0x118] sm:$0xf0]  ;;  %v966_v44 = vld [vmem:[%s1389_s0 + $0xac] sm:$0xf]  ;;  %v826_v46 = vor.u32 %v956_v40, %v825_v37  ;;  %v809_v49 = vld [vmem:[%s1389_s0 + $0x28] sm:$0xf] }
  0x17   :  { %356 = vmatpush.bf16.msrb.mxu1 %v890_v57  ;;  %v875_v45 = vld [vmem:[%s1389_s0 + $0xb8] sm:$0xf0]  ;;  %v926_v47 = vor.u32 %v978_v41, %v923_v42  ;;  %v952_v50 = vld [vmem:[%s1389_s0 + $0x34] sm:$0xf0]  ;;  %v962_v52 = vld [vmem:[%s1389_s0 + $0x8c] sm:$0xf] }
  0x18   :  { %288 = vmatpush.bf16.msra.mxu0 %v818_v60  ;;  %v878_v51 = vor.u32 %v966_v44, %v875_v45  ;;  %v859_v53 = vld [vmem:[%s1389_s0 + $0x98] sm:$0xf0]  ;;  %v810_v54 = vor.u32 %v952_v50, %v809_v49  ;;  %v793_v55 = vld [vmem:[%s1389_s0 + $0x8] sm:$0xf]  ;;  %v948_v56 = vld [vmem:[%s1389_s0 + $0x14] sm:$0xf0] }
  0x19   :  { %324 = vmatpush.bf16.msra.mxu2 %v822_v62  ;;  %380 = vmatpush.bf16.msrb.mxu3 %v922_v27  ;;  %v862_v57 = vor.u32 %v962_v52, %v859_v53  ;;  %v958_v58 = vld [vmem:[%s1389_s0 + $0x6c] sm:$0xf]  ;;  %v843_v59 = vld [vmem:[%s1389_s0 + $0x78] sm:$0xf0]  ;;  %v794_v60 = vor.u32 %v948_v56, %v793_v55  ;;  %v981_v41 = vld [vmem:[%s1391_s2] sm:$0xff]  ;;  %vm745_vm5 = vcmask 1042432  }
  0x1a   :  { %v846_v62 = vor.u32 %v958_v58, %v843_v59  ;;  %v954_v63 = vld [vmem:[%s1389_s0 + $0x4c] sm:$0xf]  ;;  %v827_v0 = vld [vmem:[%s1389_s0 + $0x58] sm:$0xf0]  ;;  %vm758_vm6 = vcmask 1043456  }
  0x1b   :  { %357 = vmatpush.bf16.msrb.mxu1 %v874_v4  ;;  %v830_v2 = vor.u32 %v954_v63, %v827_v0  ;;  %v950_v3 = vld [vmem:[%s1389_s0 + $0x2c] sm:$0xf]  ;;  %v811_v4 = vld [vmem:[%s1389_s0 + $0x38] sm:$0xf0] }
  0x1c   :  { %289 = vmatpush.bf16.msra.mxu0 %v802_v9  ;;  %v814_v5 = vor.u32 %v950_v3, %v811_v4  ;;  %v946_v6 = vld [vmem:[%s1389_s0 + $0xc] sm:$0xf]  ;;  %v795_v7 = vld [vmem:[%s1389_s0 + $0x18] sm:$0xf0] }
  0x1d   :  { %325 = vmatpush.bf16.msra.mxu2 %v806_v13  ;;  %v798_v8 = vor.u32 %v946_v6, %v795_v7 }
  0x1f   :  { %358 = vmatpush.bf16.msrb.mxu1 %v858_v22 }
  0x20   :  { %290 = vmatpush.bf16.msra.mxu0 %v786_v28 }
  0x21   :  { %326 = vmatpush.bf16.msra.mxu2 %v790_v31 }
  0x22   :  { %930 = vmatmul.msk.bf16.gmra.mxu3 %vm261_vm1, %v1212_v39  ;;  %928 = vmatmul.msk.bf16.gmra.mxu1 %vm261_vm1, %v1212_v39 }
  0x23   :  { %359 = vmatpush.bf16.msrb.mxu1 %v842_v35  ;;  %291 = vmatmul.bf16.vlgmr.msra.gmra.mxu0 %v778_v38 }
  0x24   :  { %391 = vmatpush.bf16.msrb.mxu0 %v910_v32  ;;  %327 = vmatmul.bf16.vlgmr.msra.gmra.mxu2 %v778_v38 }
  0x25   :  { %415 = vmatpush.bf16.msrb.mxu2 %v281_v36 }
  0x27   :  { %360 = vmatpush.bf16.msrb.mxu1 %v826_v46 }
  0x28   :  { %392 = vmatpush.bf16.msrb.mxu0 %v894_v43 }
  0x29   :  { %416 = vmatpush.bf16.msrb.mxu2 %v926_v47 }
  0x2b   :  { %361 = vmatpush.bf16.msrb.mxu1 %v810_v54 }
  0x2c   :  { %393 = vmatpush.bf16.msrb.mxu0 %v878_v51 }
  0x2f   :  { %362 = vmatpush.bf16.msrb.mxu1 %v794_v60 }
  0x30   :  { %394 = vmatpush.bf16.msrb.mxu0 %v862_v57 }
  0x32   :  { %931 = vmatmul.msk.bf16.vlgmr.msrb.gmra.mxu3 %vm261_vm1, %v1108_v48  ;;  %363 = vmatmul.bf16.vlgmr.msrb.gmra.mxu1 %v778_v38 }
  0x33   :  { %296 = vmatmul.bf16.gmra.mxu0 %v67_v1 }
  0x34   :  { %395 = vmatpush.bf16.msrb.mxu0 %v846_v62  ;;  %332 = vmatmul.bf16.gmra.mxu2 %v67_v1 }
  0x38   :  { %396 = vmatpush.bf16.msrb.mxu0 %v830_v2 }
  0x3c   :  { %397 = vmatpush.bf16.msrb.mxu0 %v814_v5 }
  0x40   :  { %398 = vmatpush.bf16.msrb.mxu0 %v798_v8 }
  0x42   :  { %932 = vmatmul.msk.bf16.gmra.mxu3 %vm261_vm1, %v1212_v39  ;;  %368 = vmatmul.bf16.gmra.mxu1 %v67_v1 }
  0x43   :  { %399 = vmatmul.bf16.vlgmr.msrb.gmra.mxu0 %v778_v38 }
  0x44   :  { %933 = vmatmul.msk.bf16.vlgmr.msrb.gmra.mxu2 %vm261_vm1, %v1108_v48 }
  0x53   :  { %404 = vmatmul.bf16.gmra.mxu0 %v67_v1 }
  0x54   :  { %934 = vmatmul.msk.bf16.gmra.mxu2 %vm261_vm1, %v1212_v39 }
  0x8f   :  { %v310_v9 = vpop.f32.mrf.mxu1 }
  0x95   :  { %v346_v10 = vpop.f32.mrf.mxu3 }
  0x97   :  { %v312_v11 = vpop.f32.mrf.mxu1 }
  0x9d   :  { %v348_v12 = vpop.f32.mrf.mxu3 }
  0x9f   :  { %v315_v14 = vpop.f32.mrf.mxu1 }
  0xa0   :  { %v292_v13 = vpop.f32.mrf.mxu0 }
  0xa1   :  { %v311_v26 = vadd.f32 %v310_v9, %v292_v13 }
  0xa3   :  { %v427_v34 = vmax.f32 %v311_v26, 0.0 }
  0xa5   :  { %v351_v15 = vpop.f32.mrf.mxu3 }
  0xa7   :  { %v328_v16 = vpop.f32.mrf.mxu2  ;;  %v317_v18 = vpop.f32.mrf.mxu1 }
  0xa8   :  { %v294_v17 = vpop.f32.mrf.mxu0  ;;  %v347_v39 = vadd.f32 %v346_v10, %v328_v16 }
  0xa9   :  { %v313_v24 = vadd.f32 %v312_v11, %v294_v17 }
  0xaa   :  { %v428_v46 = vmax.f32 %v347_v39, 0.0 }
  0xab   :  { %v431_v29 = vmax.f32 %v313_v24, 0.0 }
  0xad   :  { %v353_v19 = vpop.f32.mrf.mxu3  ;;  %v441_v38 = vpack.c.bf16 %v431_v29, %v427_v34 }
  0xaf   :  { %v330_v21 = vpop.f32.mrf.mxu2  ;;  %v364_v48 = vpop.f32.mrf.mxu1 }
  0xb0   :  { %v297_v22 = vpop.f32.mrf.mxu0  ;;  %v349_v36 = vadd.f32 %v348_v12, %v330_v21 }
  0xb1   :  { %v316_v23 = vadd.f32 %v315_v14, %v297_v22 }
  0xb2   :  { %v432_v42 = vmax.f32 %v349_v36, 0.0 }
  0xb3   :  { %v435_v25 = vmax.f32 %v316_v23, 0.0 }
  0xb4   :  { %v442_v50 = vpack.c.bf16 %v432_v42, %v428_v46 }
  0xb5   :  { %v445_v27 = vpack.c.bf16 %v435_v25, %v435_v25  ;;  %v382_v28 = vpop.f32.mrf.mxu3  ;;  %v995_v25 = vmov 45.254833  }
  0xb6   :  { %v383_v52 = vadd.f32 %v382_v28, %v364_v48  ;;  %v994_v48 = vmov 22.627417  }
  0xb7   :  { %v458_v30 = vand.u32 %v445_v27, %v1056_v20  ;;  %v333_v31 = vpop.f32.mrf.mxu2  ;;  %v366_v35 = vpop.f32.mrf.mxu1 }
  0xb8   :  { %v352_v32 = vadd.f32 %v351_v15, %v333_v31  ;;  %v299_v33 = vpop.f32.mrf.mxu0  ;;  %v429_v59 = vmax.f32 %v383_v52, 0.0  ;;  %v529_v15 = vlaneseq }
  0xb9   :  { %475 = vmatpush.bf16.msra.mxu1 %v458_v30 }
  0xba   :  { %v436_v37 = vmax.f32 %v352_v32, 0.0  ;;  %v1297_v17 = vand.u32 127, %v529_v15  ;;  %v530_v18 = vshrl.u32 %v529_v15, 7 }
  0xbc   :  { %v446_v40 = vpack.c.bf16 %v436_v37, %v436_v37  ;;  %v548_v19 = vshra.s32 %v1297_v17, 4  ;;  %vm564_vm2 = vcmp.eq.s32.totalorder %v530_v18, 0  ;;  %v536_v21 = vand.u32 15, %v1297_v17 }
  0xbd   :  { %476 = vmatpush.bf16.msra.mxu1 %v441_v38  ;;  %v384_v44 = vpop.f32.mrf.mxu3  ;;  %v565_v24 = vsel %vm564_vm2, 45.254833, %v994_v48  ;;  %v566_v26 = vsel %vm564_vm2, 22.627417, %v995_v25  ;;  %vm567_vm3 = vcmp.eq.s32.totalorder %v530_v18, 1  ;;  %v533_v30 = vadd.s32 128, %v1297_v17 }
  0xbe   :  { %v461_v43 = vand.u32 %v446_v40, %v1056_v20  ;;  %v385_v53 = vadd.f32 %v384_v44, %v366_v35  ;;  %v552_v23 = vand.u32 15, %v548_v19  ;;  %v540_v28 = vmul.u32 4, %v536_v21 }
  0xbf   :  { %v335_v45 = vpop.f32.mrf.mxu2  ;;  %v369_v49 = vpop.f32.mrf.mxu1  ;;  %v568_v31 = vsel %vm567_vm3, 32.0, %v565_v24  ;;  %v569_v32 = vsel %vm567_vm3, 32.0, %v566_v26  ;;  %v537_v37 = vand.u32 15, %v533_v30  ;;  %v549_v38 = vshra.s32 %v533_v30, 4 }
  0xc0   :  { %489 = vmatpush.bf16.msra.mxu3 %v461_v43  ;;  %v400_v47 = vpop.f32.mrf.mxu0  ;;  %939 = vmatmul.msk.bf16.vlgmr.msra.gmra.mxu1 %vm261_vm1, %v981_v41  ;;  %v433_v60 = vmax.f32 %v385_v53, 0.0  ;;  %v556_v33 = vmul.u32 4, %v552_v23  ;;  %v1304_v34 = vrot.slane %v568_v31, 7  ;;  %v1306_v35 = vrot.slane %v569_v32, 4 }
  0xc1   :  { %v544_v36 = vcvt.s32.f32 %v540_v28  ;;  %v1311_v44 = vmul.u32 4, %v537_v37  ;;  %v553_v45 = vand.u32 15, %v549_v38 }
  0xc2   :  { %v443_v0 = vpack.c.bf16 %v433_v60, %v429_v59  ;;  %v560_v39 = vcvt.s32.f32 %v556_v33 }
  0xc3   :  { %v557_v59 = vmul.u32 4, %v553_v45 }
  0xc4   :  { %490 = vmatpush.bf16.msra.mxu3 %v442_v50 }
  0xc5   :  { %v387_v51 = vpop.f32.mrf.mxu3  ;;  %v561_v28 = vcvt.s32.f32 %v557_v59 }
  0xc6   :  { %v388_v54 = vadd.f32 %v387_v51, %v369_v49 }
  0xc7   :  { %v418_v55 = vpop.f32.mrf.mxu2  ;;  %940 = vmatmul.msk.bf16.vlgmr.msra.gmra.mxu3 %vm261_vm1, %v981_v41  ;;  %v371_v58 = vpop.f32.mrf.mxu1 }
  0xc8   :  { %v402_v56 = vpop.f32.mrf.mxu0  ;;  %v437_v57 = vmax.f32 %v388_v54, 0.0  ;;  %v419_v8 = vadd.f32 %v418_v55, %v400_v47  ;;  %v534_v47 = vadd.s32 256, %v1297_v17  ;;  %v545_v58 = vcvt.s32.f32 %v1311_v44 }
  0xca   :  { %v447_v61 = vpack.c.bf16 %v437_v57, %v437_v57  ;;  %v430_v13 = vmax.f32 %v419_v8, 0.0  ;;  %v550_v60 = vshra.s32 %v534_v47, 4 }
  0xcc   :  { %v464_v62 = vand.u32 %v447_v61, %v1056_v20  ;;  %v554_v21 = vand.u32 15, %v550_v60 }
  0xcd   :  { %v389_v63 = vpop.f32.mrf.mxu3 }
  0xce   :  { %503 = vmatpush.bf16.msrb.mxu1 %v464_v62  ;;  %v558_v33 = vmul.u32 4, %v554_v21 }
  0xcf   :  { %v420_v1 = vpop.f32.mrf.mxu2 }
  0xd0   :  { %v405_v2 = vpop.f32.mrf.mxu0  ;;  %v421_v6 = vadd.f32 %v420_v1, %v402_v56  ;;  %v562_v45 = vcvt.s32.f32 %v558_v33 }
  0xd2   :  { %504 = vmatpush.bf16.msrb.mxu1 %v443_v0  ;;  %v434_v10 = vmax.f32 %v421_v6, 0.0 }
  0xd4   :  { %v444_v14 = vpack.c.bf16 %v434_v10, %v430_v13 }
  0xd5   :  { %941 = vmatmul.msk.bf16.vlgmr.msrb.gmra.mxu1 %vm261_vm1, %v981_v41 }
  0xd7   :  { %v423_v3 = vpop.f32.mrf.mxu2 }
  0xd8   :  { %v424_v4 = vadd.f32 %v423_v3, %v405_v2  ;;  %v407_v5 = vpop.f32.mrf.mxu0  ;;  %v538_v3 = vand.u32 15, %v534_v47 }
  0xda   :  { %v438_v7 = vmax.f32 %v424_v4, 0.0  ;;  %v542_v23 = vmul.u32 4, %v538_v3 }
  0xdc   :  { %v448_v9 = vpack.c.bf16 %v438_v7, %v438_v7 }
  0xde   :  { %v467_v11 = vand.u32 %v448_v9, %v1056_v20 }
  0xdf   :  { %v425_v12 = vpop.f32.mrf.mxu2 }
  0xe0   :  { %517 = vmatpush.bf16.msrb.mxu3 %v467_v11 }
  0xe4   :  { %518 = vmatpush.bf16.msrb.mxu3 %v444_v14 }
  0xe7   :  { %942 = vmatmul.msk.bf16.vlgmr.msrb.gmra.mxu3 %vm261_vm1, %v981_v41 }
 0x13d   :  { %v1295_v16 = vpop.f32.mrf.mxu1 }
 0x13e   :  { %v570_v43 = vadd.f32 %v544_v36, %v1295_v16  ;;  %v574_v49 = vadd.f32 %v560_v39, %v1295_v16 }
 0x145   :  { %v480_v22 = vpop.f32.mrf.mxu1 }
 0x146   :  { %v525_v20 = vmin.f32 %v480_v22, 4.1351666  ;;  %v578_v54 = vadd.f32 %v560_v39, %v480_v22 }
 0x148   :  { %v582_v27 = vmul.f32 1.442695, %v525_v20 }
 0x14a   :  { %v1301_v29 = vpop.f32.mrf.mxu3  ;;  %985 = vpow2.f32 %v582_v27 }
 0x14b   :  { %v571_v39 = vadd.f32 %v545_v58, %v1301_v29 }
 0x150   :  { %v986_v40 = vpop.eup %985 }
 0x151   :  { %v593_v41 = vmul.f32 %v986_v40, %v1304_v34  ;;  %v600_v42 = vmul.f32 %v986_v40, %v1306_v35  ;;  %v546_v40 = vcvt.s32.f32 %v542_v23 }
 0x152   :  { %v1313_v46 = vpop.f32.mrf.mxu3  ;;  %v1318_v53 = vpop.f32.mrf.mxu1 }
 0x153   :  { %v604_v50 = vmul.f32 0.5, %v593_v41  ;;  %v632_v51 = vmul.f32 0.5, %v600_v42  ;;  %v526_v52 = vmin.f32 %v1313_v46, 4.1351666  ;;  %v575_v41 = vadd.f32 %v561_v28, %v1301_v29 }
 0x154   :  { %v579_v42 = vadd.f32 %v561_v28, %v1313_v46  ;;  %v576_v3 = vadd.f32 %v562_v45, %v1318_v53 }
 0x155   :  { %v612_v55 = vrot.slane %v604_v50, 6  ;;  %v640_v56 = vrot.slane %v632_v51, 6  ;;  %v584_v57 = vmul.f32 1.442695, %v526_v52 }
 0x157   :  { %v620_v61 = vsub.f32 %v570_v43, %v612_v55  ;;  %v648_v62 = vsub.f32 %v574_v49, %v640_v56  ;;  %v652_v63 = vsub.f32 %v578_v54, %v640_v56  ;;  %v672_v0 = vadd.f32 %v612_v55, %v570_v43 }
 0x158   :  { %v684_v1 = vadd.f32 %v640_v56, %v574_v49  ;;  %v688_v2 = vadd.f32 %v640_v56, %v578_v54  ;;  %987 = vpow2.f32 %v584_v57  ;;  %v572_v56 = vadd.f32 %v546_v40, %v1318_v53 }
 0x159   :  { %v624_v4 = vmax.f32 %v620_v61, 0.0  ;;  %v656_v5 = vmax.f32 %v648_v62, 0.0  ;;  %v660_v6 = vmax.f32 %v652_v63, 0.0  ;;  %v676_v7 = vmax.f32 %v672_v0, 0.0 }
 0x15a   :  { %v692_v8 = vmax.f32 %v684_v1, 0.0  ;;  %v696_v9 = vmax.f32 %v688_v2, 0.0  ;;  %v1321_v14 = vpop.f32.mrf.mxu1 }
 0x15b   :  { %v628_v10 = vmin.f32 %v624_v4, 64.0  ;;  %v664_v11 = vmin.f32 %v656_v5, 64.0  ;;  %v668_v12 = vmin.f32 %v660_v6, 64.0  ;;  %v680_v13 = vmin.f32 %v676_v7, 64.0 }
 0x15c   :  { %v700_v15 = vmin.f32 %v692_v8, 64.0  ;;  %v704_v18 = vmin.f32 %v696_v9, 64.0  ;;  %v527_v19 = vmin.f32 %v1321_v14, 4.1351666 }
 0x15d   :  { %v712_v22 = vrot.slane %v680_v13, 2  ;;  %v746_v20 = vsel %vm745_vm5, %v1295_v16, %v628_v10 }
 0x15e   :  { %v988_v48 = vpop.eup %987  ;;  %v729_v24 = vrot.slane %v700_v15, 2  ;;  %v730_v25 = vrot.slane %v704_v18, 2  ;;  %v750_v26 = vsel %vm728_vm4, %v746_v20, %v664_v11  ;;  %v586_v27 = vmul.f32 1.442695, %v527_v19 }
 0x15f   :  { %v754_v30 = vsel %vm268_vm0, %v668_v12, %v712_v22  ;;  %763 = vst [vmem:[%s1392_s3] sm:$0xff] %v750_v26  ;;  %v594_v31 = vmul.f32 %v988_v48, %v1304_v34  ;;  %v601_v32 = vmul.f32 %v988_v48, %v1306_v35  ;;  %v580_v12 = vadd.f32 %v562_v45, %v1321_v14 }
 0x160   :  { %v731_v16 = vsel %vm728_vm4, %v729_v24, %v730_v25  ;;  %989 = vpow2.f32 %v586_v27 }
 0x161   :  { %v759_v36 = vsel %vm758_vm6, %v754_v30, %v731_v16  ;;  %v605_v37 = vmul.f32 0.5, %v594_v31  ;;  %v633_v38 = vmul.f32 0.5, %v601_v32 }
 0x162   :  { %767 = vst [vmem:[%s1392_s3 + $0x20] sm:$0x7f] %v759_v36 }
 0x163   :  { %v613_v43 = vrot.slane %v605_v37, 6  ;;  %v641_v44 = vrot.slane %v633_v38, 6 }
 0x165   :  { %v621_v47 = vsub.f32 %v571_v39, %v613_v43  ;;  %v649_v49 = vsub.f32 %v575_v41, %v641_v44  ;;  %v653_v50 = vsub.f32 %v579_v42, %v641_v44  ;;  %v673_v51 = vadd.f32 %v613_v43, %v571_v39 }
 0x166   :  { %v990_v52 = vpop.eup %989  ;;  %v685_v54 = vadd.f32 %v641_v44, %v575_v41  ;;  %v689_v55 = vadd.f32 %v641_v44, %v579_v42 }
 0x167   :  { %v625_v57 = vmax.f32 %v621_v47, 0.0  ;;  %v657_v58 = vmax.f32 %v649_v49, 0.0  ;;  %v661_v59 = vmax.f32 %v653_v50, 0.0  ;;  %v677_v60 = vmax.f32 %v673_v51, 0.0 }
 0x168   :  { %v693_v61 = vmax.f32 %v685_v54, 0.0  ;;  %v697_v62 = vmax.f32 %v689_v55, 0.0  ;;  %v595_v46 = vmul.f32 %v990_v52, %v1304_v34  ;;  %v602_v63 = vmul.f32 %v990_v52, %v1306_v35 }
 0x169   :  { %v629_v0 = vmin.f32 %v625_v57, 64.0  ;;  %v665_v1 = vmin.f32 %v657_v58, 64.0  ;;  %v681_v2 = vmin.f32 %v677_v60, 64.0  ;;  %v669_v9 = vmin.f32 %v661_v59, 64.0 }
 0x16a   :  { %v701_v4 = vmin.f32 %v693_v61, 64.0  ;;  %v705_v5 = vmin.f32 %v697_v62, 64.0  ;;  %v606_v6 = vmul.f32 0.5, %v595_v46  ;;  %v634_v7 = vmul.f32 0.5, %v602_v63  ;;  %v1345_v8 = vpop.f32.mrf.mxu3 }
 0x16b   :  { %v713_v10 = vrot.slane %v681_v2, 2  ;;  %v747_v11 = vsel %vm745_vm5, %v1301_v29, %v629_v0  ;;  %v535_v29 = vadd.s32 384, %v1297_v17 }
 0x16c   :  { %v732_v13 = vrot.slane %v701_v4, 2  ;;  %v733_v15 = vrot.slane %v705_v5, 2  ;;  %v751_v18 = vsel %vm728_vm4, %v747_v11, %v665_v1  ;;  %v614_v19 = vrot.slane %v606_v6, 6 }
 0x16d   :  { %v755_v21 = vsel %vm268_vm0, %v669_v9, %v713_v10  ;;  %764 = vst [vmem:[%s1392_s3 + $0x8] sm:$0xff] %v751_v18  ;;  %v642_v22 = vrot.slane %v634_v7, 6  ;;  %v551_v17 = vshra.s32 %v535_v29, 4  ;;  %v539_v50 = vand.u32 15, %v535_v29 }
 0x16e   :  { %v734_v20 = vsel %vm728_vm4, %v732_v13, %v733_v15  ;;  %v622_v23 = vsub.f32 %v572_v56, %v614_v19  ;;  %v674_v48 = vadd.f32 %v614_v19, %v572_v56 }
 0x16f   :  { %v760_v14 = vsel %vm758_vm6, %v755_v21, %v734_v20  ;;  %v650_v24 = vsub.f32 %v576_v3, %v642_v22  ;;  %v654_v25 = vsub.f32 %v580_v12, %v642_v22  ;;  %v686_v26 = vadd.f32 %v642_v22, %v576_v3 }
 0x170   :  { %768 = vst [vmem:[%s1392_s3 + $0x28] sm:$0x7f] %v760_v14  ;;  %v626_v27 = vmax.f32 %v622_v23, 0.0  ;;  %v678_v28 = vmax.f32 %v674_v48, 0.0  ;;  %v690_v30 = vadd.f32 %v642_v22, %v580_v12  ;;  %v555_v55 = vand.u32 15, %v551_v17 }
 0x171   :  { %v658_v31 = vmax.f32 %v650_v24, 0.0  ;;  %v662_v32 = vmax.f32 %v654_v25, 0.0  ;;  %v694_v16 = vmax.f32 %v686_v26, 0.0  ;;  %v543_v58 = vmul.u32 4, %v539_v50 }
 0x172   :  { %v630_v33 = vmin.f32 %v626_v27, 64.0  ;;  %v682_v36 = vmin.f32 %v678_v28, 64.0  ;;  %v698_v37 = vmax.f32 %v690_v30, 0.0  ;;  %v522_v38 = vpop.f32.mrf.mxu3 }
 0x173   :  { %v666_v39 = vmin.f32 %v658_v31, 64.0  ;;  %v670_v40 = vmin.f32 %v662_v32, 64.0  ;;  %v702_v41 = vmin.f32 %v694_v16, 64.0  ;;  %v528_v42 = vmin.f32 %v522_v38, 4.1351666 }
 0x174   :  { %v706_v43 = vmin.f32 %v698_v37, 64.0  ;;  %v714_v44 = vrot.slane %v682_v36, 2  ;;  %v748_v45 = vsel %vm745_vm5, %v1318_v53, %v630_v33  ;;  %v559_v53 = vmul.u32 4, %v555_v55 }
 0x175   :  { %v735_v47 = vrot.slane %v702_v41, 2  ;;  %v752_v49 = vsel %vm728_vm4, %v748_v45, %v666_v39  ;;  %v588_v51 = vmul.f32 1.442695, %v528_v42  ;;  %v547_v60 = vcvt.s32.f32 %v543_v58 }
 0x176   :  { %v736_v52 = vrot.slane %v706_v43, 2  ;;  %v756_v54 = vsel %vm268_vm0, %v670_v40, %v714_v44  ;;  %765 = vst [vmem:[%s1392_s3 + $0x10] sm:$0xff] %v752_v49  ;;  %v563_v61 = vcvt.s32.f32 %v559_v53 }
 0x177   :  { %991 = vpow2.f32 %v588_v51  ;;  %v573_v1 = vadd.f32 %v547_v60, %v1345_v8 }
 0x178   :  { %v737_v56 = vsel %vm728_vm4, %v735_v47, %v736_v52  ;;  %v577_v2 = vadd.f32 %v563_v61, %v1345_v8  ;;  %v581_v3 = vadd.f32 %v563_v61, %v522_v38 }
 0x179   :  { %v761_v57 = vsel %vm758_vm6, %v756_v54, %v737_v56 }
 0x17a   :  { %769 = vst [vmem:[%s1392_s3 + $0x30] sm:$0x7f] %v761_v57 }
 0x17d   :  { %v992_v59 = vpop.eup %991 }
 0x17e   :  { %v596_v62 = vmul.f32 %v992_v59, %v1304_v34  ;;  %v603_v46 = vmul.f32 %v992_v59, %v1306_v35 }
 0x180   :  { %v607_v63 = vmul.f32 0.5, %v596_v62  ;;  %v635_v0 = vmul.f32 0.5, %v603_v46 }
 0x182   :  { %v615_v4 = vrot.slane %v607_v63, 6  ;;  %v643_v5 = vrot.slane %v635_v0, 6 }
 0x184   :  { %v623_v6 = vsub.f32 %v573_v1, %v615_v4  ;;  %v651_v7 = vsub.f32 %v577_v2, %v643_v5  ;;  %v655_v9 = vsub.f32 %v581_v3, %v643_v5  ;;  %v675_v10 = vadd.f32 %v615_v4, %v573_v1 }
 0x185   :  { %v687_v11 = vadd.f32 %v643_v5, %v577_v2  ;;  %v691_v12 = vadd.f32 %v643_v5, %v581_v3 }
 0x186   :  { %v627_v13 = vmax.f32 %v623_v6, 0.0  ;;  %v659_v15 = vmax.f32 %v651_v7, 0.0  ;;  %v663_v34 = vmax.f32 %v655_v9, 0.0  ;;  %v679_v18 = vmax.f32 %v675_v10, 0.0 }
 0x187   :  { %v695_v35 = vmax.f32 %v687_v11, 0.0  ;;  %v699_v19 = vmax.f32 %v691_v12, 0.0 }
 0x188   :  { %v631_v21 = vmin.f32 %v627_v13, 64.0  ;;  %v667_v22 = vmin.f32 %v659_v15, 64.0  ;;  %v683_v20 = vmin.f32 %v679_v18, 64.0  ;;  %v671_v29 = vmin.f32 %v663_v34, 64.0 }
 0x189   :  { %v703_v23 = vmin.f32 %v695_v35, 64.0  ;;  %v707_v48 = vmin.f32 %v699_v19, 64.0 }
 0x18a   :  { %v715_v14 = vrot.slane %v683_v20, 2  ;;  %v749_v24 = vsel %vm745_vm5, %v1345_v8, %v631_v21 }
 0x18b   :  { %v738_v25 = vrot.slane %v703_v23, 2  ;;  %v739_v26 = vrot.slane %v707_v48, 2  ;;  %v753_v27 = vsel %vm728_vm4, %v749_v24, %v667_v22 }
 0x18c   :  { %v757_v28 = vsel %vm268_vm0, %v671_v29, %v715_v14  ;;  %766 = vst [vmem:[%s1392_s3 + $0x18] sm:$0xff] %v753_v27 }
 0x18d   :  { %v740_v30 = vsel %vm728_vm4, %v738_v25, %v739_v26 }
 0x18e   :  { %v762_v31 = vsel %vm758_vm6, %v757_v28, %v740_v30 }
 0x18f   :  { %770 = vst [vmem:[%s1392_s3 + $0x38] sm:$0x7f] %v762_v31 }

</bundles_post_ra>
